<compile_context>
chip_gen: v7x
topology: tpu7x:2x2x1
jax: 0.10.0
libtpu: 0.0.40
codegen_flags: <defaults>
</compile_context>

<pallas_src>
import jax
import jax.numpy as jnp
from jax.experimental import pallas as pl
from jax.experimental.pallas import tpu as pltpu

LANES = 128
TM_CAP = 16384                    # 16384 rows x 128 lanes x 4 B = 8 MiB / block
TM_FLOOR = 512                    # blocks below ~512x128 fall off the roofline
VMEM_LIMIT_BYTES = 52 * 1024 * 1024   # 6 x 8 MiB double-buffered blocks + slack


def _round_up(n: int, m: int) -> int:
    return ((n + m - 1) // m) * m


def _linf_clip_kernel(eps_ref, x_ref, base_ref, o_ref):
    """o = x + clip(base - x, -eps, +eps); eps read from SMEM."""
    x = x_ref[...]
    eps = eps_ref[0]
    o_ref[...] = (x + jnp.clip(base_ref[...] - x, -eps, eps)).astype(o_ref.dtype)


def _choose_tm(rows: int, sublane: int) -> int:
    """Pick the block row count.

    Big blocks amortize the ~0.35 us per-grid-step cost; >=4 grid steps give
    each TensorCore (2 on v7x) at least 2 steps so DMA/compute/writeback
    overlap; rounding to 32 keeps packed (bf16/int8) layouts unmasked.
    """
    if rows <= TM_FLOOR:
        # Tiny problem: a single block sized to the data (multiple of the
        # dtype's min sublane tile).  Per-step overhead dominates anyway.
        return _round_up(rows, sublane)
    tm = max(TM_FLOOR, _round_up(pl.cdiv(rows, 4), 32))
    return min(TM_CAP, tm)


def _linf_clip_impl(x: jax.Array, base: jax.Array,
                    eps=16.0 / 255.0) -> jax.Array:
    assert x.shape == base.shape, "x and base must have identical shapes"
    orig_shape = x.shape

    total = 1
    for d in orig_shape:
        total *= d

    if total % LANES != 0:
        # TODO(synk): rare ragged case (total not a multiple of 128).  A full
        # pad+slice round-trip costs ~2-3x the kernel's own HBM traffic, so we
        # let XLA emit one fused elementwise op instead (already at the
        # 12 B/elem HBM floor for this op).
        return (x + jnp.clip(base - x, -eps, eps)).astype(x.dtype)

    # Lane-dense (rows, 128) slab: free reshape for contiguous tensors, and
    # the 128-wide last dim gives unmasked vector stores.
    rows = total // LANES
    x2 = x.reshape(rows, LANES)
    b2 = base.reshape(rows, LANES)
    eps_arr = jnp.asarray(eps, jnp.float32).reshape(1)

    sublane = {4: 8, 2: 16, 1: 32}.get(jnp.dtype(x.dtype).itemsize, 8)
    tm = _choose_tm(rows, sublane)
    grid = (pl.cdiv(rows, tm),)   # cdiv grid: Pallas masks the ragged last block

    out2 = pl.pallas_call(
        _linf_clip_kernel,
        out_shape=jax.ShapeDtypeStruct((rows, LANES), x.dtype),
        grid_spec=pltpu.PrefetchScalarGridSpec(
            num_scalar_prefetch=1,     # eps lives in SMEM
            grid=grid,
            in_specs=[
                pl.BlockSpec((tm, LANES), lambda i, eps_ref: (i, 0)),
                pl.BlockSpec((tm, LANES), lambda i, eps_ref: (i, 0)),
            ],
            out_specs=pl.BlockSpec((tm, LANES), lambda i, eps_ref: (i, 0)),
        ),
        compiler_params=pltpu.CompilerParams(
            dimension_semantics=("parallel",),
            vmem_limit_bytes=VMEM_LIMIT_BYTES,
        ),
    )(eps_arr, x2, b2)

    return out2.reshape(orig_shape)


# One executable per (shape, dtype); eps is a traced scalar so every eps value
# reuses the same compilation.
linf_clip = jax.jit(_linf_clip_impl)


if __name__ == "__main__":
    key = jax.random.PRNGKey(0)
    k1, k2 = jax.random.split(key)

    # NCHW, small shapes: batch=2, channels=4, spatial=16
    N, C, H, W = 2, 4, 16, 16
    eps = 16.0 / 255.0

    # "original" image the module was constructed with (deterministic init)
    base = jax.random.uniform(k1, (N, C, H, W), dtype=jnp.float32)
    # perturbed input x
    x = base + 0.3 * jax.random.normal(k2, (N, C, H, W), dtype=jnp.float32)

    out = jax.block_until_ready(linf_clip(x, base, eps))

    # Reference check in plain JAX (same formula as the PyTorch module)
    ref = x + jnp.clip(base - x, -eps, eps)
    assert out.shape == x.shape and out.dtype == x.dtype
    assert jnp.allclose(out, ref, atol=1e-6), "mismatch vs reference"
    # invariant of this formula: the update step is bounded by eps
    assert float(jnp.max(jnp.abs(out - x))) <= eps + 1e-6

    # A different eps reuses the same compiled executable (eps is an SMEM
    # scalar, not a compile-time constant).
    eps2 = 4.0 / 255.0
    out2 = jax.block_until_ready(linf_clip(x, base, eps2))
    ref2 = x + jnp.clip(base - x, -eps2, eps2)
    assert jnp.allclose(out2, ref2, atol=1e-6), "mismatch vs reference (eps2)"

    # Ragged total (3*5*7 = 105, not a multiple of 128) exercises the fused
    # jnp fallback path.
    xr = jax.random.normal(k1, (3, 5, 7), dtype=jnp.float32)
    br = jax.random.normal(k2, (3, 5, 7), dtype=jnp.float32)
    outr = jax.block_until_ready(linf_clip(xr, br, eps))
    refr = xr + jnp.clip(br - xr, -eps, eps)
    assert jnp.allclose(outr, refr, atol=1e-6), "mismatch vs reference (ragged)"

    print("KERNEL_OK")
</pallas_src>

<mosaic_0001>
module attributes {stable_mosaic.version = 11 : i64} {
  func.func @_linf_clip_kernel(%arg0: i32, %arg1: memref<1xf32, #tpu.memory_space<smem>>, %arg2: memref<16x128xf32, #tpu.memory_space<vmem>>, %arg3: memref<16x128xf32, #tpu.memory_space<vmem>>, %arg4: memref<16x128xf32, #tpu.memory_space<vmem>>) attributes {dimension_semantics = [#tpu.dimension_semantics<parallel>], iteration_bounds = array<i64: 1>, scalar_prefetch = 1 : i64, scratch_operands = 0 : i64, tpu.core_type = #tpu.core_type<tc>, window_params = [{transform_indices = @transform_0, window_bounds = array<i64: 16, 128>}, {transform_indices = @transform_1, window_bounds = array<i64: 16, 128>}, {transform_indices = @transform_2, window_bounds = array<i64: 16, 128>}]} {
    %c0 = arith.constant 0 : index
    %c0_0 = arith.constant 0 : index
    %0 = vector.load %arg2[%c0, %c0_0] : memref<16x128xf32, #tpu.memory_space<vmem>>, vector<16x128xf32>
    %c0_1 = arith.constant 0 : index
    %1 = memref.load %arg1[%c0_1] : memref<1xf32, #tpu.memory_space<smem>>
    %c0_2 = arith.constant 0 : index
    %c0_3 = arith.constant 0 : index
    %2 = vector.load %arg3[%c0_2, %c0_3] : memref<16x128xf32, #tpu.memory_space<vmem>>, vector<16x128xf32>
    %3 = arith.subf %2, %0 : vector<16x128xf32>
    %cst = arith.constant 0.000000e+00 : f32
    %4 = arith.subf %cst, %1 : f32
    %5 = vector.broadcast %4 : f32 to vector<16x128xf32>
    %6 = arith.maximumf %5, %3 : vector<16x128xf32>
    %7 = vector.broadcast %1 : f32 to vector<16x128xf32>
    %8 = arith.minimumf %7, %6 : vector<16x128xf32>
    %9 = arith.addf %0, %8 : vector<16x128xf32>
    %c0_4 = arith.constant 0 : index
    %c0_5 = arith.constant 0 : index
    %10 = vector.load %arg4[%c0_4, %c0_5] : memref<16x128xf32, #tpu.memory_space<vmem>>, vector<16x128xf32>
    tpu.vector_store %arg4[%c0_4, %c0_5], %9 {strides = array<i32>} : memref<16x128xf32, #tpu.memory_space<vmem>>, vector<16x128xf32>,
    return
  }
  func.func @transform_0(%arg0: i32, %arg1: memref<1xf32, #tpu.memory_space<smem>>) -> (i32, i32) {
    %c0_i32 = arith.constant 0 : i32
    %c0_i32_0 = arith.constant 0 : i32
    return %arg0, %c0_i32 : i32, i32
  }
  func.func @transform_1(%arg0: i32, %arg1: memref<1xf32, #tpu.memory_space<smem>>) -> (i32, i32) {
    %c0_i32 = arith.constant 0 : i32
    %c0_i32_0 = arith.constant 0 : i32
    return %arg0, %c0_i32 : i32, i32
  }
  func.func @transform_2(%arg0: i32, %arg1: memref<1xf32, #tpu.memory_space<smem>>) -> (i32, i32) {
    %c0_i32 = arith.constant 0 : i32
    %c0_i32_0 = arith.constant 0 : i32
    return %arg0, %c0_i32 : i32, i32
  }
}

</mosaic_0001>

<bundles_post_ra>
// kernel: _linf_clip_impl.1
= control target key start
LH: loop header
LB: loop body
LE: loop exit
PB: predicated region body
PF: predicated region fallthrough
CT: control target
= control target key end

     0   :  { %s79_s0 = inlined_call_operand.<no memory space> [shape: f32[1], index: 0, kind: input, shape index: {}]   ;;  %s80_s1 = inlined_call_operand.vmem [shape: f32[16,128], index: 1, kind: input, shape index: {}]   ;;  %s81_s2 = inlined_call_operand.vmem [shape: f32[16,128], index: 2, kind: input, shape index: {}]   ;;  %s82_s3 = inlined_call_operand.vmem [shape: f32[16,128], index: 3, kind: output, shape index: {}]  }
   0x1   :  { %v13_v0 = vld [vmem:[%s80_s1] sm:$0xff]  ;;  %s20_s18 = ssub.f32 0.0, %s79_s0  ;;  %v14_v2 = vld [vmem:[%s80_s1 + $0x8] sm:$0xff]  ;;  %v24_v6 = vstv %s79_s0 }
   0x2   :  { %v16_v1 = vld [vmem:[%s81_s2] sm:$0xff]  ;;  %v17_v4 = vld [vmem:[%s81_s2 + $0x8] sm:$0xff] }
   0x3   :  { %v18_v3 = vsub.f32 %v16_v1, %v13_v0  ;;  %v21_v5 = vstv %s20_s18  ;;  %v19_v7 = vsub.f32 %v17_v4, %v14_v2 }
   0x5   :  { %v22_v8 = vmax.f32 %v21_v5, %v18_v3  ;;  %v23_v9 = vmax.f32 %v21_v5, %v19_v7 }
   0x7   :  { %v25_v10 = vmin.f32 %v24_v6, %v22_v8  ;;  %v26_v11 = vmin.f32 %v24_v6, %v23_v9 }
   0x9   :  { %v27_v12 = vadd.f32 %v25_v10, %v13_v0  ;;  %v28_v13 = vadd.f32 %v26_v11, %v14_v2 }
   0xb   :  { %29 = vst [vmem:[%s82_s3] sm:$0xff] %v27_v12  ;;  %30 = vst [vmem:[%s82_s3 + $0x8] sm:$0xff] %v28_v13 }

</bundles_post_ra>
